<compile_context>
chip_gen: v6e
topology: v6e:2x2x1
jax: 0.10.0
libtpu: 0.0.40
codegen_flags: <defaults>
</compile_context>

<pallas_src>
import jax
import jax.numpy as jnp
from jax.experimental import pallas as pl
from jax.experimental.pallas import tpu as pltpu


def _round_up(x, m):
    return ((x + m - 1) // m) * m


def _fc_relu_kernel(x_ref, w_ref, b_ref, o_ref):
    """One (batch-tile, H-tile) block of the squashed-batch dense layer."""
    x = x_ref[...]                                   # [TM, D]  bf16
    w = w_ref[...]                                   # [D, TN]  bf16 (resident when Nt==1)
    b = b_ref[...]                                   # [1, TN]  bf16
    y = jnp.dot(x, w, preferred_element_type=jnp.float32)
    y = y + b.astype(jnp.float32)
    o_ref[...] = jnp.maximum(y, 0.0).astype(o_ref.dtype)


def batch_squash_network_forward(x, w, b, batch_dims=2, tile_m=512, tile_n=512,
                                 compute_dtype=jnp.bfloat16):
    """Forward pass of BatchSquashNetwork wrapping a Linear+ReLU network.

    Args:
      x: [B1, B2, D]  (batch_dims leading batch axes, features last)
      w: [D, H] dense weight
      b: [H]    dense bias
      tile_m: max rows of the squashed batch per grid step (multiple of 16).
      tile_n: max output columns per grid step (multiple of 128).
      compute_dtype: MXU input dtype (bf16 recommended; accumulation is f32).
    Returns:
      (output, state) with output [B1, B2, H] in x.dtype and state == () —
      matching BatchSquashNetwork.forward for a stateless wrapped network.
    """
    assert batch_dims == 2, "this instance squashes two batch dims"
    B1, B2, D = x.shape
    H = w.shape[1]
    BN = B1 * B2
    out_dtype = x.dtype

    # --- Batch tile: multiple of 16 (bf16 sublanes), >= 4 grid steps when BN
    # is large (v7x dual-core), full extent when BN is small.
    tm_target = _round_up(max(pl.cdiv(BN, 4), 1), 16)
    TM = min(_round_up(tile_m, 16), tm_target)
    if TM >= BN:
        TM = BN                      # single full-extent batch block (always legal)
    Mt = pl.cdiv(BN, TM)

    # --- H tile: lane-dense 128-multiple blocks when H allows it, otherwise a
    # single full-extent block (masked stores, but no pad/slice HBM passes).
    if H % 128 == 0:
        TN = min(H, _round_up(tile_n, 128))
    else:
        TN = H
    Nt = pl.cdiv(H, TN)

    # BatchSquash.flatten: [B1, B2, D] -> [B1*B2, D]   (glue, plain JAX)
    x_flat = x.reshape(BN, D)
    x_c = x_flat if x_flat.dtype == compute_dtype else x_flat.astype(compute_dtype)
    w_c = w if w.dtype == compute_dtype else w.astype(compute_dtype)
    b_c = b.reshape(1, H).astype(compute_dtype)

    in_item = jnp.dtype(compute_dtype).itemsize
    out_item = jnp.dtype(out_dtype).itemsize

    cost = pl.CostEstimate(
        flops=2 * BN * D * H,
        transcendentals=0,
        bytes_accessed=in_item * (BN * D + D * H + H) + out_item * BN * H,
    )

    # Double-buffered tile footprint + headroom (explicit so the v5e 16 MiB
    # scoped default never bites; stays well under v7x's 64 MiB physical).
    tile_bytes = 2 * (TM * D * in_item + D * TN * in_item + TN * in_item
                      + TM * TN * out_item)
    vmem_limit = int(min(64 * 1024 * 1024, max(2 * tile_bytes, 16 * 1024 * 1024)))

    out = pl.pallas_call(
        _fc_relu_kernel,
        out_shape=jax.ShapeDtypeStruct((BN, H), out_dtype),
        grid_spec=pltpu.PrefetchScalarGridSpec(
            num_scalar_prefetch=0,
            grid=(Mt, Nt),
            in_specs=[
                pl.BlockSpec((TM, D), lambda i, j: (i, 0)),   # batch tile (pipelined)
                pl.BlockSpec((D, TN), lambda i, j: (0, j)),   # weight (resident if Nt==1)
                pl.BlockSpec((1, TN), lambda i, j: (0, j)),   # bias
            ],
            out_specs=pl.BlockSpec((TM, TN), lambda i, j: (i, j)),
        ),
        compiler_params=pltpu.CompilerParams(
            dimension_semantics=("parallel", "parallel"),
            vmem_limit_bytes=vmem_limit,
        ),
        cost_estimate=cost,
    )(x_c, w_c, b_c)

    # BatchSquash.unflatten: [B1*B2, H] -> [B1, B2, H]
    output = out.reshape(B1, B2, H)
    new_state = ()   # wrapped network is stateless (state_spec = ())
    return output, new_state


def _reference(x, w, b):
    B1, B2, D = x.shape
    y = jnp.maximum(x.reshape(B1 * B2, D) @ w + b, 0.0)
    return y.reshape(B1, B2, w.shape[1])


if __name__ == "__main__":
    key = jax.random.PRNGKey(0)
    k_x, k_w, k_b = jax.random.split(key, 3)

    # Small shapes: outer batch B1=2, parallel/replica batch B2=4,
    # input features D=32, hidden H=32.
    B1, B2, D, H = 2, 4, 32, 32
    x = jax.random.normal(k_x, (B1, B2, D), dtype=jnp.float32)
    # Deterministic parameter init (synthetic, not a checkpoint).
    w = (jax.random.normal(k_w, (D, H), dtype=jnp.float32)
         * (1.0 / jnp.sqrt(jnp.float32(D))))
    b = jax.random.normal(k_b, (H,), dtype=jnp.float32) * 0.01

    out, state = batch_squash_network_forward(x, w, b, batch_dims=2)
    out = jax.block_until_ready(out)

    ref = _reference(x, w, b)
    assert out.shape == (B1, B2, H)
    assert state == ()
    # bf16 MXU inputs (f32 accumulation) -> widened tolerance vs f32 reference.
    assert jnp.allclose(out, ref, atol=5e-2, rtol=5e-2)

    print("KERNEL_OK")
</pallas_src>

<mosaic_0001>
module attributes {stable_mosaic.version = 11 : i64} {
  func.func @_fc_relu_kernel(%arg0: i32, %arg1: i32, %arg2: memref<8x32xbf16, #tpu.memory_space<vmem>>, %arg3: memref<32x32xbf16, #tpu.memory_space<vmem>>, %arg4: memref<1x32xbf16, #tpu.memory_space<vmem>>, %arg5: memref<8x32xf32, #tpu.memory_space<vmem>>) attributes {dimension_semantics = [#tpu.dimension_semantics<parallel>, #tpu.dimension_semantics<parallel>], iteration_bounds = array<i64: 1, 1>, scalar_prefetch = 0 : i64, scratch_operands = 0 : i64, tpu.core_type = #tpu.core_type<tc>, window_params = [{transform_indices = @transform_0, window_bounds = array<i64: 8, 32>}, {transform_indices = @transform_1, window_bounds = array<i64: 32, 32>}, {transform_indices = @transform_2, window_bounds = array<i64: 1, 32>}, {transform_indices = @transform_3, window_bounds = array<i64: 8, 32>}]} {
    %c0 = arith.constant 0 : index
    %c0_0 = arith.constant 0 : index
    %0 = vector.load %arg2[%c0, %c0_0] : memref<8x32xbf16, #tpu.memory_space<vmem>>, vector<8x32xbf16>
    %c0_1 = arith.constant 0 : index
    %c0_2 = arith.constant 0 : index
    %1 = vector.load %arg3[%c0_1, %c0_2] : memref<32x32xbf16, #tpu.memory_space<vmem>>, vector<32x32xbf16>
    %c0_3 = arith.constant 0 : index
    %c0_4 = arith.constant 0 : index
    %2 = vector.load %arg4[%c0_3, %c0_4] : memref<1x32xbf16, #tpu.memory_space<vmem>>, vector<1x32xbf16>
    %cst = arith.constant dense<0.000000e+00> : vector<8x32xf32>
    %3 = tpu.matmul %0, %1, %cst {dimension_numbers = #tpu.dot_dimension_numbers<[1], [0], [0], [1], [0, 0, 1, 1], [], []>} : vector<8x32xbf16>, vector<32x32xbf16>, vector<8x32xf32> -> vector<8x32xf32>
    %4 = arith.extf %2 : vector<1x32xbf16> to vector<1x32xf32>
    %5 = vector.broadcast %4 : vector<1x32xf32> to vector<8x32xf32>
    %6 = arith.addf %3, %5 : vector<8x32xf32>
    %cst_5 = arith.constant 0.000000e+00 : f32
    %7 = vector.broadcast %cst_5 : f32 to vector<8x32xf32>
    %8 = arith.maximumf %6, %7 : vector<8x32xf32>
    %c0_6 = arith.constant 0 : index
    %c0_7 = arith.constant 0 : index
    %9 = vector.load %arg5[%c0_6, %c0_7] : memref<8x32xf32, #tpu.memory_space<vmem>>, vector<8x32xf32>
    tpu.vector_store %arg5[%c0_6, %c0_7], %8 {strides = array<i32>} : memref<8x32xf32, #tpu.memory_space<vmem>>, vector<8x32xf32>,
    return
  }
  func.func @transform_0(%arg0: i32, %arg1: i32) -> (i32, i32) {
    %c0_i32 = arith.constant 0 : i32
    %c0_i32_0 = arith.constant 0 : i32
    return %arg0, %c0_i32 : i32, i32
  }
  func.func @transform_1(%arg0: i32, %arg1: i32) -> (i32, i32) {
    %c0_i32 = arith.constant 0 : i32
    %c0_i32_0 = arith.constant 0 : i32
    return %c0_i32, %arg1 : i32, i32
  }
  func.func @transform_2(%arg0: i32, %arg1: i32) -> (i32, i32) {
    %c0_i32 = arith.constant 0 : i32
    %c0_i32_0 = arith.constant 0 : i32
    return %c0_i32, %arg1 : i32, i32
  }
  func.func @transform_3(%arg0: i32, %arg1: i32) -> (i32, i32) {
    %c0_i32 = arith.constant 0 : i32
    return %arg0, %arg1 : i32, i32
  }
}

</mosaic_0001>

<bundles_post_ra>
// kernel: tpu_custom_call.1
= control target key start
LH: loop header
LB: loop body
LE: loop exit
PB: predicated region body
PF: predicated region fallthrough
CT: control target
= control target key end

     0   :  { %8 = vsyncpa [#allocation3], 0  ;;  %s257_s0 = inlined_call_operand.hbm [shape: bf16[8,32], index: 0, kind: input, shape index: {}]   ;;  %s258_s1 = inlined_call_operand.hbm [shape: bf16[32,32], index: 1, kind: input, shape index: {}]   ;;  %s259_s2 = inlined_call_operand.vmem [shape: bf16[1,32], index: 2, kind: input, shape index: {}]   ;;  %s260_s3 = inlined_call_operand.hbm [shape: f32[8,32], index: 3, kind: output, shape index: {}]  }
   0x1   :  { %9 = vsyncpa [#allocation6], 0 }
   0x2   :  { %10 = vsyncpa [#allocation4], 0  ;;  %s216_s12 = smov [#allocation2]   ;;  %s217_s14 = smov [#allocation5]  }
   0x3   :  { %s17_s13 = sshll.u32 %s216_s12, 4  ;;  %s26_s15 = sshll.u32 %s217_s14, 4  ;;  %s18_s13 = int_to_ptr.vmem [resolvable:$true] %s17_s13  ;;  %s27_s15 = int_to_ptr.vmem [resolvable:$true] %s26_s15 }
   0x4   :  { %s158_s16 = scalar_lea.vmem %s18_s13, 64  ;;  %p163_p1 = scmp.lt.s32.totalorder %s18_s13, %s18_s13 }
   0x5   :  { %p159_p0 = scmp.ne.s32.totalorder %s18_s13, %s158_s16  ;;  %p164_p2 = scmp.lt.s32.totalorder %s158_s16, %s158_s16 }
   0x7   :  { %p165_p3 = por %p164_p2, %p163_p1 }
   0x9   :  { %p166_p4 = pnand %p165_p3, %p159_p0 }
   0xb   :  { %169 = shalt.err (!%p166_p4)
}
   0xc   :  { %20 = dma.hbm_to_vmem [thread:$0]  %s257_s0, 64, %s18_s13, [#allocation3]  }
   0xd   :  { %s178_s19 = scalar_lea.vmem %s27_s15, 256  ;;  %p183_p6 = scmp.lt.s32.totalorder %s27_s15, %s27_s15 }
   0xe   :  { %p179_p5 = scmp.ne.s32.totalorder %s27_s15, %s178_s19  ;;  %p184_p7 = scmp.lt.s32.totalorder %s178_s19, %s178_s19 }
  0x10   :  { %p185_p8 = por %p184_p7, %p183_p6 }
  0x12   :  { %p186_p9 = pnand %p185_p8, %p179_p5 }
  0x14   :  { %189 = shalt.err (!%p186_p9)
}
  0x15   :  { %s218_s20 = smov 64   ;;  %s219_s21 = smov 4  }
  0x16   :  { %32 = dma.hbm_to_vmem [thread:$0]  %s258_s1, 256, %s27_s15, [#allocation6], %s218_s20, %s218_s20, %s219_s21  }
  0x17   :  { %210 = dma.done.wait [#allocation3], 64  }
  0x18   :  { %211 = vsyncadd [#allocation3], 4294967232 }
  0x19   :  { %212 = dma.done.wait [#allocation6], 256  }
  0x1a   :  { %213 = vsyncadd [#allocation6], 4294967040  ;;  %v220_v0 = vmov 0.0   ;;  %vm221_vm0 = vmmov 0   ;;  %v148_v1 = vld [vmem:[#allocation5 + $0x8] sm:$0xff]   ;;  %v149_v2 = vld [vmem:[#allocation5] sm:$0xff]   ;;  %v49_v4 = vlaneseq }
  0x1b   :  { %133 = vmatprep.subr.bf16.mxu0 %v220_v0  ;;  %137 = vmatprep.mubr.msk.bf16.mxu0 %vm221_vm0, %v220_v0  ;;  %v42_v3 = vld [vmem:[#allocation2] sm:$0xf]  ;;  %vm65_vm1 = vcmask 261120   ;;  %s222_s24 = smov [#allocation7]  }
  0x1c   :  { %134 = vmatpush3.bf16.msra.mxu0 %v148_v1  ;;  %v50_v5 = vshrl.u32 %v49_v4, 7  ;;  %v47_v6 = vld [vmem:[%s259_s2] sm:$0x1]  ;;  %s117_s25 = sshll.u32 %s222_s24, 4  ;;  %s118_s25 = int_to_ptr.vmem [resolvable:$true] %s117_s25 }
  0x1d   :  { %135 = vmatprep.subr.bf16.mxu0 %v220_v0  ;;  %v48_v7 = vunpack.c.l.bf16 %v47_v6  ;;  %s190_s26 = scalar_lea.vmem %s118_s25, 128  ;;  %p195_p11 = scmp.lt.s32.totalorder %s118_s25, %s118_s25 }
  0x1e   :  { %v51_v8 = vsub.s32 0, %v50_v5  ;;  %p191_p10 = scmp.ne.s32.totalorder %s118_s25, %s190_s26  ;;  %p196_p12 = scmp.lt.s32.totalorder %s190_s26, %s190_s26 }
  0x20   :  { %136 = vmatpush3.bf16.msra.mxu0 %v149_v2  ;;  %v52_v9 = vrot.slane %v48_v7, %v51_v8  ;;  %p197_p13 = por %p196_p12, %p195_p11 }
  0x22   :  { %p198_p0 = pnand %p197_p13, %p191_p10 }
  0x23   :  { %138 = vmatmul.mubr.msk.bf16.vlgmr.msra.gmra.mxu0 %vm65_vm1, %v42_v3 }
  0xe3   :  { %v103_v10 = vpop.f32.mrf.mxu0 }
  0xe4   :  { %v104_v11 = vadd.f32 %v103_v10, %v52_v9 }
  0xe5   :  { %v139_v12 = vpop.f32.mrf.mxu0 }
  0xe6   :  { %v109_v13 = vmax.f32 %v104_v11, 0.0 }
  0xe7   :  { %v106_v14 = vpop.f32.mrf.mxu0 }
  0xe8   :  { %110 = vst.msk [vmem:[#allocation7] sm:$0xff] %vm65_vm1, %v109_v13 }
  0xe9   :  { %v140_v15 = vpop.f32.mrf.mxu0 }
  0xea   :  { %201 = shalt.err (!%p198_p0)
}
  0xeb   :  { %120 = dma.vmem_to_hbm [thread:$0]  %s118_s25, 128, %s260_s3, [#allocation4]  }
  0xec   :  { %214 = dma.done.wait [#allocation4], 128  }
  0xed   :  { %215 = vsyncadd [#allocation4], 4294967168 }
  0xee   :  { %124 = vsyncpa [#allocation3], 1 }
  0xef   :  { %125 = vsyncpa [#allocation6], 1 }
  0xf0   :  { %126 = vsyncpa [#allocation4], 1 }

</bundles_post_ra>
